<compile_context>
chip_gen: v5e
topology: v5e:2x2
jax: 0.10.0
libtpu: 0.0.40
codegen_flags: <defaults>
</compile_context>

<pallas_src>
import math
import functools

import jax
import jax.numpy as jnp
from jax.experimental import pallas as pl
from jax.experimental.pallas import tpu as pltpu


def _round_up(a, b):
    return ((a + b - 1) // b) * b


def _layernorm(x, gamma, beta, eps=1e-6):
    # x: (tm, d) f32; gamma/beta: (1, d) f32
    mean = jnp.mean(x, axis=-1, keepdims=True)
    xc = x - mean
    var = jnp.mean(xc * xc, axis=-1, keepdims=True)
    inv = jax.lax.rsqrt(var + eps)
    return xc * inv * gamma + beta


_SQRT_2_OVER_PI = math.sqrt(2.0 / math.pi)
_INV_SQRT2 = 1.0 / math.sqrt(2.0)


def _gelu(x, approx):
    if approx:
        # tanh approximation: transcendental routes through the (otherwise
        # idle) EUP slot instead of a long erf VALU polynomial.  Numerics
        # differ slightly from torch's default exact GELU.
        inner = _SQRT_2_OVER_PI * (x + 0.044715 * x * x * x)
        return 0.5 * x * (1.0 + jnp.tanh(inner))
    # exact (erf) GELU, matching torch.nn.functional.gelu default
    return 0.5 * x * (1.0 + jax.lax.erf(x * _INV_SQRT2))


def ffn_kernel(x_ref, w1_ref, b1_ref, w2_ref, b2_ref, g_ref, be_ref, o_ref,
               xn_ref, acc_ref, *, gelu_approx):
    k = pl.program_id(1)
    nk = pl.num_programs(1)

    @pl.when(k == 0)
    def _init():
        # Pre-norm once per row tile; cache LN(x) in the dot dtype so the
        # cast is paid once per row tile (not once per k step) and the
        # scratch is half-size when weights are bf16.
        x = x_ref[...].astype(jnp.float32)
        gamma = g_ref[...].astype(jnp.float32)
        beta = be_ref[...].astype(jnp.float32)
        xn_ref[...] = _layernorm(x, gamma, beta).astype(xn_ref.dtype)

    # Matmuls run in the stored weight dtype (bf16 MXU fast path if bf16),
    # with f32 accumulation via preferred_element_type.
    xn = xn_ref[...]

    # Linear 1 chunk + GELU   (dropout == identity in eval)
    h = jnp.dot(xn, w1_ref[...], preferred_element_type=jnp.float32)
    h = h + b1_ref[...].astype(jnp.float32)
    h = _gelu(h, gelu_approx)

    # Linear 2 chunk, accumulated over the hidden-dim grid axis.
    partial = jnp.dot(h.astype(w2_ref.dtype), w2_ref[...],
                      preferred_element_type=jnp.float32)

    @pl.when(k == 0)
    def _first():
        acc_ref[...] = partial          # no zero-init + add round-trip

    @pl.when(k != 0)
    def _accum():
        acc_ref[...] += partial

    @pl.when(k == nk - 1)
    def _finalize():
        x = x_ref[...].astype(jnp.float32)
        gamma = g_ref[...].astype(jnp.float32)
        beta = be_ref[...].astype(jnp.float32)
        y = acc_ref[...] + b2_ref[...].astype(jnp.float32)
        z = y + x                       # residual add
        o_ref[...] = _layernorm(z, gamma, beta).astype(o_ref.dtype)


def _vmem_tile_bytes(tm, tk_h, d_in, x_bytes, w_bytes, dot_bytes):
    """Rough per-pipeline VMEM footprint for the chosen tiles."""
    b = 2 * tm * d_in * x_bytes          # x block, double-buffered
    b += 2 * tm * d_in * x_bytes         # out block, double-buffered
    b += 2 * d_in * tk_h * w_bytes       # W1 chunk, double-buffered
    b += 2 * tk_h * d_in * w_bytes       # W2 chunk, double-buffered
    b += 2 * (tk_h + 3 * d_in) * 4       # b1 / b2 / gamma / beta
    b += tm * d_in * dot_bytes           # cached LN(x) scratch
    b += tm * d_in * 4                   # f32 accumulator scratch
    b += 2 * tm * tk_h * 4               # hidden-activation temporaries
    return b


@functools.partial(
    jax.jit,
    static_argnames=("tm", "tk_h", "gelu_approx", "compute_dtype"))
def ffn_forward(x, w1, b1, w2, b2, gamma, beta, *, tm=512, tk_h=None,
                gelu_approx=False, compute_dtype=None):
    """x: [..., d_input]; w1: (d_in, d_hid); w2: (d_hid, d_in).

    Returns the same shape/dtype as x.
      gelu_approx:   use tanh-approx GELU (numerics-changing, faster VALU).
      compute_dtype: e.g. jnp.bfloat16 to run the matmuls in bf16
                     (numerics-changing; halves weight DMA + VMEM).
    """
    orig_shape = x.shape
    d_in = orig_shape[-1]
    d_hid = w1.shape[1]

    # Optional fast-math weight cast (gated; default keeps stored dtype).
    if compute_dtype is not None:
        w1 = w1.astype(compute_dtype)
        w2 = w2.astype(compute_dtype)

    x2d = x.reshape(-1, d_in)
    m = x2d.shape[0]

    x_bytes = jnp.dtype(x.dtype).itemsize
    w_bytes = jnp.dtype(w1.dtype).itemsize
    dot_bytes = w_bytes

    # VMEM budget from the actual chip (v5e/v6e: 128 MiB, v7x: 64 MiB per
    # TC); keep ~30% headroom for compiler-internal scratch.
    try:
        vmem_cap = int(pltpu.get_tpu_info().vmem_capacity_bytes)
    except Exception:
        vmem_cap = 64 * 1024 * 1024
    budget = int(vmem_cap * 0.70)

    # Row tile: large and 256-aligned when possible (matches the 256x256
    # MXU on v6e/v7x); clamp for small inputs so tiny batches don't pad to
    # a full tile.  Rows are zero-padded to a multiple of tm.
    tm_eff = min(tm, _round_up(m, 8))
    if tm_eff >= 256:
        tm_eff = (tm_eff // 256) * 256
    tm_eff = max(8, _round_up(tm_eff, 8))

    # Hidden-dim chunk: keep the whole (128-padded) hidden dim resident when
    # it fits the VMEM budget -> nk == 1, weights DMA'd from HBM exactly
    # once and resident across all row tiles.  Otherwise shrink the chunk
    # (and, last resort, the row tile) until the budget holds.
    d_hid_128 = _round_up(d_hid, 128)
    if tk_h is None:
        tk_eff = d_hid_128
    else:
        tk_eff = _round_up(min(tk_h, d_hid_128), 128)
    while tk_eff > 128 and _vmem_tile_bytes(
            tm_eff, tk_eff, d_in, x_bytes, w_bytes, dot_bytes) > budget:
        tk_eff = _round_up(tk_eff // 2, 128)
    while tm_eff > 8 and _vmem_tile_bytes(
            tm_eff, tk_eff, d_in, x_bytes, w_bytes, dot_bytes) > budget:
        tm_eff = max(8, _round_up(tm_eff // 2, 8))

    # Pad rows to a multiple of tm_eff (padded rows give finite LN output
    # and are sliced off afterwards).
    m_pad = _round_up(m, tm_eff)
    if m_pad != m:
        x2d = jnp.pad(x2d, ((0, m_pad - m), (0, 0)))

    # Zero-pad d_hid to a multiple of tk_eff (exact: gelu(0) == 0 and zero
    # W2 rows contribute nothing).
    d_hid_pad = _round_up(d_hid, tk_eff)
    if d_hid_pad != d_hid:
        w1 = jnp.pad(w1, ((0, 0), (0, d_hid_pad - d_hid)))
        b1 = jnp.pad(b1, (0, d_hid_pad - d_hid))
        w2 = jnp.pad(w2, ((0, d_hid_pad - d_hid), (0, 0)))

    b1_2d = b1.reshape(1, d_hid_pad)
    b2_2d = b2.reshape(1, d_in)
    g_2d = gamma.reshape(1, d_in)
    be_2d = beta.reshape(1, d_in)

    n_row_tiles = m_pad // tm_eff
    nk = d_hid_pad // tk_eff
    grid = (n_row_tiles, nk)

    # Advisory cost estimate so XLA schedules the surrounding pad / reshape /
    # slice around the kernel instead of serializing on it.
    weight_passes = 1 if nk == 1 else n_row_tiles
    cost = pl.CostEstimate(
        flops=4 * m_pad * d_in * d_hid_pad,
        transcendentals=m_pad * d_hid_pad,
        bytes_accessed=(2 * m_pad * d_in * x_bytes
                        + 2 * d_in * d_hid_pad * w_bytes * weight_passes
                        + (d_hid_pad + 3 * d_in) * 4),
    )

    kernel = functools.partial(ffn_kernel, gelu_approx=gelu_approx)

    out2d = pl.pallas_call(
        kernel,
        out_shape=jax.ShapeDtypeStruct((m_pad, d_in), x.dtype),
        grid_spec=pltpu.PrefetchScalarGridSpec(
            num_scalar_prefetch=0,
            grid=grid,
            in_specs=[
                pl.BlockSpec((tm_eff, d_in), lambda i, k: (i, 0)),    # x rows
                pl.BlockSpec((d_in, tk_eff), lambda i, k: (0, k)),    # W1
                pl.BlockSpec((1, tk_eff), lambda i, k: (0, k)),       # b1
                pl.BlockSpec((tk_eff, d_in), lambda i, k: (k, 0)),    # W2
                pl.BlockSpec((1, d_in), lambda i, k: (0, 0)),         # b2
                pl.BlockSpec((1, d_in), lambda i, k: (0, 0)),         # gamma
                pl.BlockSpec((1, d_in), lambda i, k: (0, 0)),         # beta
            ],
            out_specs=pl.BlockSpec((tm_eff, d_in), lambda i, k: (i, 0)),
            scratch_shapes=[
                pltpu.VMEM((tm_eff, d_in), w1.dtype),      # cached LN(x)
                pltpu.VMEM((tm_eff, d_in), jnp.float32),   # f32 accumulator
            ],
        ),
        compiler_params=pltpu.CompilerParams(
            dimension_semantics=("parallel", "arbitrary"),
            vmem_limit_bytes=budget,
        ),
        cost_estimate=cost,
    )(x2d, w1, b1_2d, w2, b2_2d, g_2d, be_2d)

    if m_pad != m:
        out2d = out2d[:m]
    return out2d.reshape(orig_shape)


def _reference(x, w1, b1, w2, b2, gamma, beta, eps=1e-6):
    def ln(v):
        mu = jnp.mean(v, axis=-1, keepdims=True)
        var = jnp.mean((v - mu) ** 2, axis=-1, keepdims=True)
        return (v - mu) / jnp.sqrt(var + eps) * gamma + beta
    res = x
    h = ln(x)
    h = jax.nn.gelu(h @ w1 + b1, approximate=False)
    h = h @ w2 + b2
    return ln(h + res)


if __name__ == "__main__":
    # Small but lane-dense shapes: x [batch, seq, d_input].
    # seq=9 exercises the row-padding path.
    batch, seq, d_input, d_hidden = 2, 9, 128, 256

    key = jax.random.PRNGKey(0)
    kx, kw1, kb1, kw2, kb2 = jax.random.split(key, 5)

    x = jax.random.normal(kx, (batch, seq, d_input), dtype=jnp.float32)

    # Deterministic synthetic parameters (Linear weights stored pre-transposed).
    w1 = jax.random.normal(kw1, (d_input, d_hidden), jnp.float32) / math.sqrt(d_input)
    b1 = jax.random.normal(kb1, (d_hidden,), jnp.float32) * 0.01
    w2 = jax.random.normal(kw2, (d_hidden, d_input), jnp.float32) / math.sqrt(d_hidden)
    b2 = jax.random.normal(kb2, (d_input,), jnp.float32) * 0.01
    gamma = jnp.ones((d_input,), jnp.float32)
    beta = jnp.zeros((d_input,), jnp.float32)

    ref = _reference(x, w1, b1, w2, b2, gamma, beta)

    # Default path: f32 weights, exact erf GELU (torch-parity numerics).
    out = ffn_forward(x, w1, b1, w2, b2, gamma, beta)
    out = jax.block_until_ready(out)
    assert out.shape == x.shape and out.dtype == x.dtype
    assert jnp.allclose(out, ref, atol=1e-4, rtol=1e-4), "mismatch vs JAX reference"

    # Fast-math path (bf16 matmuls + tanh GELU), gated behind flags; looser
    # tolerance since numerics intentionally differ.
    out_fast = ffn_forward(x, w1, b1, w2, b2, gamma, beta,
                           gelu_approx=True, compute_dtype=jnp.bfloat16)
    out_fast = jax.block_until_ready(out_fast)
    assert out_fast.shape == x.shape and out_fast.dtype == x.dtype
    assert jnp.allclose(out_fast, ref, atol=1e-1, rtol=1e-1), "bf16 path mismatch"

    print("KERNEL_OK")
</pallas_src>

<mosaic_0001>
module attributes {stable_mosaic.version = 11 : i64} {
  func.func @ffn_kernel(%arg0: i32, %arg1: i32, %arg2: memref<24x128xf32, #tpu.memory_space<vmem>>, %arg3: memref<128x256xf32, #tpu.memory_space<vmem>>, %arg4: memref<1x256xf32, #tpu.memory_space<vmem>>, %arg5: memref<256x128xf32, #tpu.memory_space<vmem>>, %arg6: memref<1x128xf32, #tpu.memory_space<vmem>>, %arg7: memref<1x128xf32, #tpu.memory_space<vmem>>, %arg8: memref<1x128xf32, #tpu.memory_space<vmem>>, %arg9: memref<24x128xf32, #tpu.memory_space<vmem>>, %arg10: memref<24x128xf32, #tpu.memory_space<vmem>>, %arg11: memref<24x128xf32, #tpu.memory_space<vmem>>) attributes {dimension_semantics = [#tpu.dimension_semantics<parallel>, #tpu.dimension_semantics<arbitrary>], iteration_bounds = array<i64: 1, 1>, scalar_prefetch = 0 : i64, scratch_operands = 2 : i64, tpu.core_type = #tpu.core_type<tc>, window_params = [{transform_indices = @transform_0, window_bounds = array<i64: 24, 128>}, {transform_indices = @transform_1, window_bounds = array<i64: 128, 256>}, {transform_indices = @transform_2, window_bounds = array<i64: 1, 256>}, {transform_indices = @transform_3, window_bounds = array<i64: 256, 128>}, {pipeline_mode = #tpu.pipeline_mode<synchronous>, transform_indices = @transform_4, window_bounds = array<i64: 1, 128>}, {pipeline_mode = #tpu.pipeline_mode<synchronous>, transform_indices = @transform_5, window_bounds = array<i64: 1, 128>}, {pipeline_mode = #tpu.pipeline_mode<synchronous>, transform_indices = @transform_6, window_bounds = array<i64: 1, 128>}, {transform_indices = @transform_7, window_bounds = array<i64: 24, 128>}]} {
    %c0_i32 = arith.constant 0 : i32
    %0 = arith.cmpi eq, %arg1, %c0_i32 : i32
    %1 = arith.extui %0 : i1 to i32
    %c0_i32_0 = arith.constant 0 : i32
    %2 = arith.cmpi ne, %1, %c0_i32_0 : i32
    scf.if %2 {
      %c0_18 = arith.constant 0 : index
      %c0_19 = arith.constant 0 : index
      %28 = vector.load %arg2[%c0_18, %c0_19] : memref<24x128xf32, #tpu.memory_space<vmem>>, vector<24x128xf32>
      %c0_20 = arith.constant 0 : index
      %c0_21 = arith.constant 0 : index
      %29 = vector.load %arg7[%c0_20, %c0_21] : memref<1x128xf32, #tpu.memory_space<vmem>>, vector<1x128xf32>
      %c0_22 = arith.constant 0 : index
      %c0_23 = arith.constant 0 : index
      %30 = vector.load %arg8[%c0_22, %c0_23] : memref<1x128xf32, #tpu.memory_space<vmem>>, vector<1x128xf32>
      %cst_24 = arith.constant dense<0.000000e+00> : vector<24xf32>
      %31 = vector.multi_reduction <add>, %28, %cst_24 [1] : vector<24x128xf32> to vector<24xf32>
      %32 = vector.shape_cast %31 : vector<24xf32> to vector<24x1xf32>
      %cst_25 = arith.constant 1.280000e+02 : f32
      %33 = vector.broadcast %cst_25 : f32 to vector<24x1xf32>
      %34 = arith.divf %32, %33 : vector<24x1xf32>
      %35 = vector.broadcast %34 : vector<24x1xf32> to vector<24x128xf32>
      %36 = arith.subf %28, %35 : vector<24x128xf32>
      %37 = arith.mulf %36, %36 : vector<24x128xf32>
      %cst_26 = arith.constant dense<0.000000e+00> : vector<24xf32>
      %38 = vector.multi_reduction <add>, %37, %cst_26 [1] : vector<24x128xf32> to vector<24xf32>
      %39 = vector.shape_cast %38 : vector<24xf32> to vector<24x1xf32>
      %cst_27 = arith.constant 1.280000e+02 : f32
      %40 = vector.broadcast %cst_27 : f32 to vector<24x1xf32>
      %41 = arith.divf %39, %40 : vector<24x1xf32>
      %cst_28 = arith.constant 9.99999997E-7 : f32
      %42 = vector.broadcast %cst_28 : f32 to vector<24x1xf32>
      %43 = arith.addf %41, %42 : vector<24x1xf32>
      %44 = math.rsqrt %43 : vector<24x1xf32>
      %45 = vector.broadcast %44 : vector<24x1xf32> to vector<24x128xf32>
      %46 = arith.mulf %36, %45 : vector<24x128xf32>
      %47 = vector.broadcast %29 : vector<1x128xf32> to vector<24x128xf32>
      %48 = arith.mulf %46, %47 : vector<24x128xf32>
      %49 = vector.broadcast %30 : vector<1x128xf32> to vector<24x128xf32>
      %50 = arith.addf %48, %49 : vector<24x128xf32>
      %c0_29 = arith.constant 0 : index
      %c0_30 = arith.constant 0 : index
      %51 = vector.load %arg10[%c0_29, %c0_30] : memref<24x128xf32, #tpu.memory_space<vmem>>, vector<24x128xf32>
      tpu.vector_store %arg10[%c0_29, %c0_30], %50 {strides = array<i32>} : memref<24x128xf32, #tpu.memory_space<vmem>>, vector<24x128xf32>,
    } else {
    }
    %c0 = arith.constant 0 : index
    %c0_1 = arith.constant 0 : index
    %3 = vector.load %arg10[%c0, %c0_1] : memref<24x128xf32, #tpu.memory_space<vmem>>, vector<24x128xf32>
    %c0_2 = arith.constant 0 : index
    %c0_3 = arith.constant 0 : index
    %4 = vector.load %arg3[%c0_2, %c0_3] : memref<128x256xf32, #tpu.memory_space<vmem>>, vector<128x256xf32>
    %cst = arith.constant dense<0.000000e+00> : vector<24x256xf32>
    %5 = tpu.matmul %3, %4, %cst {dimension_numbers = #tpu.dot_dimension_numbers<[1], [0], [0], [1], [0, 0, 1, 1], [], []>} : vector<24x128xf32>, vector<128x256xf32>, vector<24x256xf32> -> vector<24x256xf32>
    %c0_4 = arith.constant 0 : index
    %c0_5 = arith.constant 0 : index
    %6 = vector.load %arg4[%c0_4, %c0_5] : memref<1x256xf32, #tpu.memory_space<vmem>>, vector<1x256xf32>
    %7 = vector.broadcast %6 : vector<1x256xf32> to vector<24x256xf32>
    %8 = arith.addf %5, %7 : vector<24x256xf32>
    %cst_6 = arith.constant 5.000000e-01 : f32
    %9 = vector.broadcast %cst_6 : f32 to vector<24x256xf32>
    %10 = arith.mulf %9, %8 : vector<24x256xf32>
    %cst_7 = arith.constant 0.707106769 : f32
    %11 = vector.broadcast %cst_7 : f32 to vector<24x256xf32>
    %12 = arith.mulf %8, %11 : vector<24x256xf32>
    %13 = math.erf %12 : vector<24x256xf32>
    %cst_8 = arith.constant 1.000000e+00 : f32
    %14 = vector.broadcast %cst_8 : f32 to vector<24x256xf32>
    %15 = arith.addf %14, %13 : vector<24x256xf32>
    %16 = arith.mulf %10, %15 : vector<24x256xf32>
    %c0_9 = arith.constant 0 : index
    %c0_10 = arith.constant 0 : index
    %17 = vector.load %arg5[%c0_9, %c0_10] : memref<256x128xf32, #tpu.memory_space<vmem>>, vector<256x128xf32>
    %cst_11 = arith.constant dense<0.000000e+00> : vector<24x128xf32>
    %18 = tpu.matmul %16, %17, %cst_11 {dimension_numbers = #tpu.dot_dimension_numbers<[1], [0], [0], [1], [0, 0, 1, 1], [], []>} : vector<24x256xf32>, vector<256x128xf32>, vector<24x128xf32> -> vector<24x128xf32>
    %c0_i32_12 = arith.constant 0 : i32
    %19 = arith.cmpi eq, %arg1, %c0_i32_12 : i32
    %20 = arith.extui %19 : i1 to i32
    %c0_i32_13 = arith.constant 0 : i32
    %21 = arith.cmpi ne, %20, %c0_i32_13 : i32
    scf.if %21 {
      %c0_18 = arith.constant 0 : index
      %c0_19 = arith.constant 0 : index
      %28 = vector.load %arg11[%c0_18, %c0_19] : memref<24x128xf32, #tpu.memory_space<vmem>>, vector<24x128xf32>
      tpu.vector_store %arg11[%c0_18, %c0_19], %18 {strides = array<i32>} : memref<24x128xf32, #tpu.memory_space<vmem>>, vector<24x128xf32>,
    } else {
    }
    %c0_i32_14 = arith.constant 0 : i32
    %22 = arith.cmpi ne, %arg1, %c0_i32_14 : i32
    %23 = arith.extui %22 : i1 to i32
    %c0_i32_15 = arith.constant 0 : i32
    %24 = arith.cmpi ne, %23, %c0_i32_15 : i32
    scf.if %24 {
      %c0_18 = arith.constant 0 : index
      %c0_19 = arith.constant 0 : index
      %28 = vector.load %arg11[%c0_18, %c0_19] : memref<24x128xf32, #tpu.memory_space<vmem>>, vector<24x128xf32>
      %29 = arith.addf %28, %18 : vector<24x128xf32>
      %c0_20 = arith.constant 0 : index
      %c0_21 = arith.constant 0 : index
      %30 = vector.load %arg11[%c0_20, %c0_21] : memref<24x128xf32, #tpu.memory_space<vmem>>, vector<24x128xf32>
      tpu.vector_store %arg11[%c0_20, %c0_21], %29 {strides = array<i32>} : memref<24x128xf32, #tpu.memory_space<vmem>>, vector<24x128xf32>,
    } else {
    }
    %c0_i32_16 = arith.constant 0 : i32
    %25 = arith.cmpi eq, %arg1, %c0_i32_16 : i32
    %26 = arith.extui %25 : i1 to i32
    %c0_i32_17 = arith.constant 0 : i32
    %27 = arith.cmpi ne, %26, %c0_i32_17 : i32
    scf.if %27 {
      %c0_18 = arith.constant 0 : index
      %c0_19 = arith.constant 0 : index
      %28 = vector.load %arg2[%c0_18, %c0_19] : memref<24x128xf32, #tpu.memory_space<vmem>>, vector<24x128xf32>
      %c0_20 = arith.constant 0 : index
      %c0_21 = arith.constant 0 : index
      %29 = vector.load %arg7[%c0_20, %c0_21] : memref<1x128xf32, #tpu.memory_space<vmem>>, vector<1x128xf32>
      %c0_22 = arith.constant 0 : index
      %c0_23 = arith.constant 0 : index
      %30 = vector.load %arg8[%c0_22, %c0_23] : memref<1x128xf32, #tpu.memory_space<vmem>>, vector<1x128xf32>
      %c0_24 = arith.constant 0 : index
      %c0_25 = arith.constant 0 : index
      %31 = vector.load %arg11[%c0_24, %c0_25] : memref<24x128xf32, #tpu.memory_space<vmem>>, vector<24x128xf32>
      %c0_26 = arith.constant 0 : index
      %c0_27 = arith.constant 0 : index
      %32 = vector.load %arg6[%c0_26, %c0_27] : memref<1x128xf32, #tpu.memory_space<vmem>>, vector<1x128xf32>
      %33 = vector.broadcast %32 : vector<1x128xf32> to vector<24x128xf32>
      %34 = arith.addf %31, %33 : vector<24x128xf32>
      %35 = arith.addf %34, %28 : vector<24x128xf32>
      %cst_28 = arith.constant dense<0.000000e+00> : vector<24xf32>
      %36 = vector.multi_reduction <add>, %35, %cst_28 [1] : vector<24x128xf32> to vector<24xf32>
      %37 = vector.shape_cast %36 : vector<24xf32> to vector<24x1xf32>
      %cst_29 = arith.constant 1.280000e+02 : f32
      %38 = vector.broadcast %cst_29 : f32 to vector<24x1xf32>
      %39 = arith.divf %37, %38 : vector<24x1xf32>
      %40 = vector.broadcast %39 : vector<24x1xf32> to vector<24x128xf32>
      %41 = arith.subf %35, %40 : vector<24x128xf32>
      %42 = arith.mulf %41, %41 : vector<24x128xf32>
      %cst_30 = arith.constant dense<0.000000e+00> : vector<24xf32>
      %43 = vector.multi_reduction <add>, %42, %cst_30 [1] : vector<24x128xf32> to vector<24xf32>
      %44 = vector.shape_cast %43 : vector<24xf32> to vector<24x1xf32>
      %cst_31 = arith.constant 1.280000e+02 : f32
      %45 = vector.broadcast %cst_31 : f32 to vector<24x1xf32>
      %46 = arith.divf %44, %45 : vector<24x1xf32>
      %cst_32 = arith.constant 9.99999997E-7 : f32
      %47 = vector.broadcast %cst_32 : f32 to vector<24x1xf32>
      %48 = arith.addf %46, %47 : vector<24x1xf32>
      %49 = math.rsqrt %48 : vector<24x1xf32>
      %50 = vector.broadcast %49 : vector<24x1xf32> to vector<24x128xf32>
      %51 = arith.mulf %41, %50 : vector<24x128xf32>
      %52 = vector.broadcast %29 : vector<1x128xf32> to vector<24x128xf32>
      %53 = arith.mulf %51, %52 : vector<24x128xf32>
      %54 = vector.broadcast %30 : vector<1x128xf32> to vector<24x128xf32>
      %55 = arith.addf %53, %54 : vector<24x128xf32>
      %c0_33 = arith.constant 0 : index
      %c0_34 = arith.constant 0 : index
      %56 = vector.load %arg9[%c0_33, %c0_34] : memref<24x128xf32, #tpu.memory_space<vmem>>, vector<24x128xf32>
      tpu.vector_store %arg9[%c0_33, %c0_34], %55 {strides = array<i32>} : memref<24x128xf32, #tpu.memory_space<vmem>>, vector<24x128xf32>,
    } else {
    }
    return
  }
  func.func @transform_0(%arg0: i32, %arg1: i32) -> (i32, i32) {
    %c0_i32 = arith.constant 0 : i32
    %c0_i32_0 = arith.constant 0 : i32
    return %arg0, %c0_i32 : i32, i32
  }
  func.func @transform_1(%arg0: i32, %arg1: i32) -> (i32, i32) {
    %c0_i32 = arith.constant 0 : i32
    %c0_i32_0 = arith.constant 0 : i32
    return %c0_i32, %arg1 : i32, i32
  }
  func.func @transform_2(%arg0: i32, %arg1: i32) -> (i32, i32) {
    %c0_i32 = arith.constant 0 : i32
    %c0_i32_0 = arith.constant 0 : i32
    return %c0_i32, %arg1 : i32, i32
  }
  func.func @transform_3(%arg0: i32, %arg1: i32) -> (i32, i32) {
    %c0_i32 = arith.constant 0 : i32
    %c0_i32_0 = arith.constant 0 : i32
    return %arg1, %c0_i32 : i32, i32
  }
  func.func @transform_4(%arg0: i32, %arg1: i32) -> (i32, i32) {
    %c0_i32 = arith.constant 0 : i32
    %c0_i32_0 = arith.constant 0 : i32
    %c0_i32_1 = arith.constant 0 : i32
    return %c0_i32, %c0_i32_0 : i32, i32
  }
  func.func @transform_5(%arg0: i32, %arg1: i32) -> (i32, i32) {
    %c0_i32 = arith.constant 0 : i32
    %c0_i32_0 = arith.constant 0 : i32
    %c0_i32_1 = arith.constant 0 : i32
    return %c0_i32, %c0_i32_0 : i32, i32
  }
  func.func @transform_6(%arg0: i32, %arg1: i32) -> (i32, i32) {
    %c0_i32 = arith.constant 0 : i32
    %c0_i32_0 = arith.constant 0 : i32
    %c0_i32_1 = arith.constant 0 : i32
    return %c0_i32, %c0_i32_0 : i32, i32
  }
  func.func @transform_7(%arg0: i32, %arg1: i32) -> (i32, i32) {
    %c0_i32 = arith.constant 0 : i32
    %c0_i32_0 = arith.constant 0 : i32
    return %arg0, %c0_i32 : i32, i32
  }
}

</mosaic_0001>

<bundles_post_ra>
// kernel: ffn_forward.1
= control target key start
LH: loop header
LB: loop body
LE: loop exit
PB: predicated region body
PF: predicated region fallthrough
CT: control target
= control target key end

     0   :  { %12 = vsyncpa [#allocation5], 0  ;;  %s1119_s0 = inlined_call_operand.vmem [shape: f32[24,128], index: 0, kind: input, shape index: {}]   ;;  %s1120_s1 = inlined_call_operand.hbm [shape: f32[128,256], index: 1, kind: input, shape index: {}]   ;;  %s1121_s2 = inlined_call_operand.vmem [shape: f32[1,256], index: 2, kind: input, shape index: {}]   ;;  %s1122_s3 = inlined_call_operand.hbm [shape: f32[256,128], index: 3, kind: input, shape index: {}]   ;;  %s1123_s4 = inlined_call_operand.vmem [shape: f32[1,128], index: 4, kind: input, shape index: {}]   ;;  %s1124_s5 = inlined_call_operand.vmem [shape: f32[1,128], index: 5, kind: input, shape index: {}]   ;;  %s1125_s6 = inlined_call_operand.vmem [shape: f32[1,128], index: 6, kind: input, shape index: {}]   ;;  %s1126_s7 = inlined_call_operand.vmem [shape: f32[24,128], index: 7, kind: output, shape index: {}]  }
   0x1   :  { %s20_s26 = sshll.u32 %s1120_s1, 4  ;;  %s21_s26 = int_to_ptr.hbm [resolvable:$true] %s20_s26 }
   0x2   :  { %13 = vsyncpa [#allocation7], 0  ;;  %s816_s27 = smov [#allocation4]   ;;  %s35_s8 = sshll.u32 %s1122_s3, 4  ;;  %s36_s8 = int_to_ptr.hbm [resolvable:$true] %s35_s8 }
   0x3   :  { %s22_s28 = sshll.u32 %s816_s27, 4  ;;  %s817_s9 = smov 256   ;;  %s23_s28 = int_to_ptr.vmem [resolvable:$true] %s22_s28 }
   0x4   :  { %s818_s10 = smov 16   ;;  %s819_s11 = smov [#allocation6]  }
   0x5   :  { %28 = dma.hbm_to_vmem [thread:$0]  %s21_s26, 4096, %s23_s28, [#allocation5], %s817_s9, %s817_s9, %s818_s10  }
   0x6   :  { %s37_s12 = sshll.u32 %s819_s11, 4  ;;  %s820_s13 = smov 128   ;;  %s38_s12 = int_to_ptr.vmem [resolvable:$true] %s37_s12 }
   0x7   :  { %s821_s14 = smov 8  }
   0x8   :  { %43 = dma.hbm_to_vmem [thread:$0]  %s36_s8, 4096, %s38_s12, [#allocation7], %s820_s13, %s820_s13, %s821_s14  }
   0x9   :  { %812 = dma.done.wait [#allocation5], 4096  }
   0xa   :  { %813 = vsyncadd [#allocation5], 4294963200 }
   0xb   :  { %814 = dma.done.wait [#allocation7], 4096  }
   0xc   :  { %815 = vsyncadd [#allocation7], 4294963200  ;;  %v62_v0 = vld [vmem:[%s1119_s0] sm:$0xff]  ;;  %v64_v1 = vld [vmem:[%s1119_s0 + $0x10] sm:$0xff]  ;;  %v822_v3 = vmov 128.0  }
   0xd   :  { %67 = vadd.xlane.f32.xlu0 %v62_v0  ;;  %71 = vadd.xlane.f32.xlu1 %v64_v1  ;;  %v878_v2 = vld [vmem:[%s1119_s0 + $0x8] sm:$0xff]  ;;  %736 = vrcp.f32 %v822_v3  ;;  %v182_v8 = vld [vmem:[#allocation4 + $0xf0] sm:$0xff]  ;;  %v183_v9 = vld [vmem:[#allocation4 + $0xf8] sm:$0xff] }
   0xe   :  { %v180_v10 = vld [vmem:[#allocation4 + $0xe0] sm:$0xff]  ;;  %190 = vmatpush.msra.mxu0 %v182_v8  ;;  %216 = vmatpush.msra.mxu1 %v183_v9  ;;  %v181_v11 = vld [vmem:[#allocation4 + $0xe8] sm:$0xff]  ;;  %v178_v26 = vld [vmem:[#allocation4 + $0xd0] sm:$0xff] }
   0xf   :  { %v179_v27 = vld [vmem:[#allocation4 + $0xd8] sm:$0xff]  ;;  %v176_v28 = vld [vmem:[#allocation4 + $0xc0] sm:$0xff]  ;;  %v177_v29 = vld [vmem:[#allocation4 + $0xc8] sm:$0xff] }
  0x10   :  { %191 = vmatpush.msra.mxu0 %v180_v10  ;;  %217 = vmatpush.msra.mxu1 %v181_v11  ;;  %v174_v30 = vld [vmem:[#allocation4 + $0xb0] sm:$0xff]  ;;  %v175_v31 = vld [vmem:[#allocation4 + $0xb8] sm:$0xff]  ;;  %v172_v32 = vld [vmem:[#allocation4 + $0xa0] sm:$0xff] }
  0x11   :  { %v173_v33 = vld [vmem:[#allocation4 + $0xa8] sm:$0xff]  ;;  %v170_v34 = vld [vmem:[#allocation4 + $0x90] sm:$0xff]  ;;  %v171_v35 = vld [vmem:[#allocation4 + $0x98] sm:$0xff] }
  0x12   :  { %192 = vmatpush.msra.mxu0 %v178_v26  ;;  %218 = vmatpush.msra.mxu1 %v179_v27  ;;  %v168_v36 = vld [vmem:[#allocation4 + $0x80] sm:$0xff]  ;;  %v169_v37 = vld [vmem:[#allocation4 + $0x88] sm:$0xff]  ;;  %v166_v38 = vld [vmem:[#allocation4 + $0x70] sm:$0xff] }
  0x13   :  { %v737_v4 = vpop.eup %736  ;;  %v167_v39 = vld [vmem:[#allocation4 + $0x78] sm:$0xff]  ;;  %v164_v40 = vld [vmem:[#allocation4 + $0x60] sm:$0xff]  ;;  %v165_v41 = vld [vmem:[#allocation4 + $0x68] sm:$0xff] }
  0x14   :  { %v74_v5 = vmul.f32 128.0, %v737_v4  ;;  %vm78_vm0 = vweird.f32 %v737_v4  ;;  %193 = vmatpush.msra.mxu0 %v176_v28  ;;  %219 = vmatpush.msra.mxu1 %v177_v29  ;;  %v162_v42 = vld [vmem:[#allocation4 + $0x50] sm:$0xff]  ;;  %v163_v43 = vld [vmem:[#allocation4 + $0x58] sm:$0xff]  ;;  %v160_v44 = vld [vmem:[#allocation4 + $0x40] sm:$0xff] }
  0x15   :  { %69 = vadd.xlane.f32.xlu0 %v878_v2  ;;  %v161_v45 = vld [vmem:[#allocation4 + $0x48] sm:$0xff]  ;;  %v158_v46 = vld [vmem:[#allocation4 + $0x30] sm:$0xff]  ;;  %v159_v47 = vld [vmem:[#allocation4 + $0x38] sm:$0xff] }
  0x16   :  { %v75_v6 = vsub.f32 1.0, %v74_v5  ;;  %194 = vmatpush.msra.mxu0 %v174_v30  ;;  %220 = vmatpush.msra.mxu1 %v175_v31  ;;  %v156_v48 = vld [vmem:[#allocation4 + $0x20] sm:$0xff]  ;;  %v157_v49 = vld [vmem:[#allocation4 + $0x28] sm:$0xff]  ;;  %v154_v50 = vld [vmem:[#allocation4 + $0x10] sm:$0xff] }
  0x17   :  { %v155_v51 = vld [vmem:[#allocation4 + $0x18] sm:$0xff]  ;;  %v152_v52 = vld [vmem:[#allocation4] sm:$0xff]  ;;  %v153_v53 = vld [vmem:[#allocation4 + $0x8] sm:$0xff] }
  0x18   :  { %v76_v7 = vmul.f32 %v737_v4, %v75_v6  ;;  %195 = vmatpush.msra.mxu0 %v172_v32  ;;  %221 = vmatpush.msra.mxu1 %v173_v33  ;;  %v731_v8 = vld [vmem:[%s1124_s5] ss:$0 sm:$0xff] }
  0x1a   :  { %v77_v12 = vadd.f32 %v737_v4, %v76_v7  ;;  %196 = vmatpush.msra.mxu0 %v170_v34  ;;  %222 = vmatpush.msra.mxu1 %v171_v35  ;;  %v521_v35 = vld [vmem:[#allocation6 + $0x78] sm:$0xff] }
  0x1b   :  { %538 = vmatpush.msra.mxu2 %v521_v35 }
  0x1c   :  { %v881_v13 = vsel %vm78_vm0, %v737_v4, %v77_v12  ;;  %197 = vmatpush.msra.mxu0 %v168_v36  ;;  %223 = vmatpush.msra.mxu1 %v169_v37  ;;  %v732_v12 = vld [vmem:[%s1125_s6] ss:$0 sm:$0xff]  ;;  %v537_v36 = vld [vmem:[#allocation6 + $0xf8] sm:$0xff]  ;;  %v520_v37 = vld [vmem:[#allocation6 + $0x70] sm:$0xff] }
  0x1d   :  { %564 = vmatpush.msra.mxu3 %v537_v36  ;;  %539 = vmatpush.msra.mxu2 %v520_v37 }
  0x1e   :  { %198 = vmatpush.msra.mxu0 %v166_v38  ;;  %224 = vmatpush.msra.mxu1 %v167_v39  ;;  %v536_v38 = vld [vmem:[#allocation6 + $0xf0] sm:$0xff]  ;;  %v519_v39 = vld [vmem:[#allocation6 + $0x68] sm:$0xff] }
  0x1f   :  { %565 = vmatpush.msra.mxu3 %v536_v38  ;;  %540 = vmatpush.msra.mxu2 %v519_v39 }
  0x20   :  { %199 = vmatpush.msra.mxu0 %v164_v40  ;;  %225 = vmatpush.msra.mxu1 %v165_v41  ;;  %v535_v40 = vld [vmem:[#allocation6 + $0xe8] sm:$0xff] }
  0x21   :  { %566 = vmatpush.msra.mxu3 %v535_v40 }
  0x22   :  { %200 = vmatpush.msra.mxu0 %v162_v42  ;;  %226 = vmatpush.msra.mxu1 %v163_v43  ;;  %v518_v42 = vld [vmem:[#allocation6 + $0x60] sm:$0xff] }
  0x23   :  { %v534_v43 = vld [vmem:[#allocation6 + $0xe0] sm:$0xff]  ;;  %541 = vmatpush.msra.mxu2 %v518_v42 }
  0x24   :  { %201 = vmatpush.msra.mxu0 %v160_v44  ;;  %227 = vmatpush.msra.mxu1 %v161_v45 }
  0x25   :  { %567 = vmatpush.msra.mxu3 %v534_v43  ;;  %v524_v43 = vld [vmem:[#allocation6 + $0x90] sm:$0xff] }
  0x26   :  { %202 = vmatpush.msra.mxu0 %v158_v46  ;;  %228 = vmatpush.msra.mxu1 %v159_v47  ;;  %v517_v46 = vld [vmem:[#allocation6 + $0x58] sm:$0xff] }
  0x27   :  { %v533_v47 = vld [vmem:[#allocation6 + $0xd8] sm:$0xff]  ;;  %542 = vmatpush.msra.mxu2 %v517_v46 }
  0x28   :  { %203 = vmatpush.msra.mxu0 %v156_v48  ;;  %229 = vmatpush.msra.mxu1 %v157_v49 }
  0x29   :  { %568 = vmatpush.msra.mxu3 %v533_v47 }
  0x2a   :  { %204 = vmatpush.msra.mxu0 %v154_v50  ;;  %230 = vmatpush.msra.mxu1 %v155_v51  ;;  %v516_v50 = vld [vmem:[#allocation6 + $0x50] sm:$0xff] }
  0x2b   :  { %v532_v51 = vld [vmem:[#allocation6 + $0xd0] sm:$0xff]  ;;  %543 = vmatpush.msra.mxu2 %v516_v50 }
  0x2c   :  { %205 = vmatpush.msra.mxu0 %v152_v52  ;;  %231 = vmatpush.msra.mxu1 %v153_v53 }
  0x2d   :  { %569 = vmatpush.msra.mxu3 %v532_v51  ;;  %v523_v51 = vld [vmem:[#allocation6 + $0x88] sm:$0xff] }
  0x80   :  { %v68_v14 = vpop.xlane.xlu0 %67  ;;  %v72_v19 = vpop.xlane.xlu1 %71 }
  0x81   :  { %v80_v15 = vmul.f32 %v881_v13, %v68_v14  ;;  %v82_v22 = vmul.f32 %v881_v13, %v72_v19 }
  0x83   :  { %v884_v16 = vsub.f32 %v62_v0, %v80_v15  ;;  %v895_v24 = vsub.f32 %v64_v1, %v82_v22 }
  0x85   :  { %v86_v17 = vmul.f32 %v884_v16, %v884_v16  ;;  %v88_v25 = vmul.f32 %v895_v24, %v895_v24 }
  0x87   :  { %89 = vadd.xlane.f32.xlu1 %v86_v17 }
  0x88   :  { %v70_v18 = vpop.xlane.xlu0 %69 }
  0x89   :  { %v81_v20 = vmul.f32 %v881_v13, %v70_v18 }
  0x8b   :  { %v890_v21 = vsub.f32 %v878_v2, %v81_v20 }
  0x8d   :  { %v87_v23 = vmul.f32 %v890_v21, %v890_v21 }
  0x8f   :  { %91 = vadd.xlane.f32.xlu2 %v87_v23 }
  0x97   :  { %93 = vadd.xlane.f32.xlu2 %v88_v25 }
  0xfa   :  { %v90_v54 = vpop.xlane.xlu1 %89 }
  0xfb   :  { %v95_v55 = vmul.f32 %v90_v54, %v881_v13  ;;  %v515_v54 = vld [vmem:[#allocation6 + $0x48] sm:$0xff] }
  0xfc   :  { %544 = vmatpush.msra.mxu2 %v515_v54  ;;  %v506_v54 = vld [vmem:[#allocation6] sm:$0xff] }
  0xfd   :  { %v98_v56 = vadd.f32 1e-06, %v95_v55  ;;  %v531_v55 = vld [vmem:[#allocation6 + $0xc8] sm:$0xff] }
  0xfe   :  { %570 = vmatpush.msra.mxu3 %v531_v55 }
  0xff   :  { %738 = vrsqrt.f32 %v98_v56  ;;  %vm107_vm2 = vweird.f32 %v98_v56 }
 0x102   :  { %v92_v57 = vpop.xlane.xlu2 %91 }
 0x103   :  { %v96_v58 = vmul.f32 %v92_v57, %v881_v13 }
 0x105   :  { %v739_v59 = vpop.eup %738  ;;  %v99_v60 = vadd.f32 1e-06, %v96_v58  ;;  %v514_v58 = vld [vmem:[#allocation6 + $0x40] sm:$0xff] }
 0x106   :  { %v102_v61 = vmul.f32 %v739_v59, %v98_v56  ;;  %vm108_vm1 = vweird.f32 %v739_v59  ;;  %545 = vmatpush.msra.mxu2 %v514_v58  ;;  %v522_v58 = vld [vmem:[#allocation6 + $0x80] sm:$0xff] }
 0x107   :  { %740 = vrsqrt.f32 %v99_v60  ;;  %vm109_vm3 = vmor %vm107_vm2, %vm108_vm1  ;;  %vm117_vm5 = vweird.f32 %v99_v60 }
 0x108   :  { %v103_v62 = vmul.f32 %v739_v59, %v102_v61 }
 0x10a   :  { %v104_v63 = vmul.f32 0.5, %v103_v62  ;;  %v94_v0 = vpop.xlane.xlu2 %93 }
 0x10b   :  { %v97_v1 = vmul.f32 %v94_v0, %v881_v13  ;;  %v513_v0 = vld [vmem:[#allocation6 + $0x38] sm:$0xff] }
 0x10c   :  { %v105_v3 = vsub.f32 1.5, %v104_v63  ;;  %546 = vmatpush.msra.mxu2 %v513_v0 }
 0x10d   :  { %v741_v4 = vpop.eup %740  ;;  %v100_v5 = vadd.f32 1e-06, %v97_v1  ;;  %v529_v1 = vld [vmem:[#allocation6 + $0xb8] sm:$0xff] }
 0x10e   :  { %v106_v6 = vmul.f32 %v739_v59, %v105_v3  ;;  %v112_v7 = vmul.f32 %v741_v4, %v99_v60  ;;  %vm118_vm4 = vweird.f32 %v741_v4 }
 0x10f   :  { %742 = vrsqrt.f32 %v100_v5  ;;  %vm119_vm6 = vmor %vm117_vm5, %vm118_vm4  ;;  %vm127_vm8 = vweird.f32 %v100_v5 }
 0x110   :  { %v113_v9 = vmul.f32 %v741_v4, %v112_v7  ;;  %v110_v10 = vsel %vm109_vm3, %v739_v59, %v106_v6  ;;  %v530_v59 = vld [vmem:[#allocation6 + $0xc0] sm:$0xff]  ;;  %v512_v7 = vld [vmem:[#allocation6 + $0x30] sm:$0xff] }
 0x111   :  { %v131_v11 = vmul.f32 %v110_v10, %v884_v16  ;;  %571 = vmatpush.msra.mxu3 %v530_v59  ;;  %547 = vmatpush.msra.mxu2 %v512_v7 }
 0x112   :  { %v114_v14 = vmul.f32 0.5, %v113_v9 }
 0x113   :  { %v137_v15 = vmul.f32 %v731_v8, %v131_v11  ;;  %572 = vmatpush.msra.mxu3 %v529_v1 }
 0x114   :  { %v115_v17 = vsub.f32 1.5, %v114_v14 }
 0x115   :  { %v743_v18 = vpop.eup %742  ;;  %v143_v19 = vadd.f32 %v732_v12, %v137_v15 }
 0x116   :  { %v116_v20 = vmul.f32 %v741_v4, %v115_v17  ;;  %v122_v22 = vmul.f32 %v743_v18, %v100_v5  ;;  %vm128_vm7 = vweird.f32 %v743_v18  ;;  %v511_v17 = vld [vmem:[#allocation6 + $0x28] sm:$0xff] }
 0x117   :  { %206 = vmatmul.f32.vlgmr.msra.gmra.mxu0 %v143_v19  ;;  %232 = vmatmul.f32.vlgmr.msra.gmra.mxu1 %v143_v19  ;;  %vm129_vm9 = vmor %vm127_vm8, %vm128_vm7 }
 0x118   :  { %v123_v23 = vmul.f32 %v743_v18, %v122_v22  ;;  %v120_v25 = vsel %vm119_vm6, %v741_v4, %v116_v20  ;;  %548 = vmatpush.msra.mxu2 %v511_v17 }
 0x119   :  { %v132_v16 = vmul.f32 %v120_v25, %v890_v21  ;;  %v184_v21 = vld [vmem:[%s1121_s2] sm:$0x3] }
 0x11a   :  { %v124_v26 = vmul.f32 0.5, %v123_v23  ;;  %v914_v41 = vperm.slane %v184_v21, 0 }
 0x11b   :  { %v138_v27 = vmul.f32 %v731_v8, %v132_v16 }
 0x11c   :  { %v125_v28 = vsub.f32 1.5, %v124_v26  ;;  %v510_v26 = vld [vmem:[#allocation6 + $0x20] sm:$0xff] }
 0x11d   :  { %v144_v29 = vadd.f32 %v732_v12, %v138_v27  ;;  %v526_v27 = vld [vmem:[#allocation6 + $0xa0] sm:$0xff]  ;;  %549 = vmatpush.msra.mxu2 %v510_v26 }
 0x11e   :  { %v126_v30 = vmul.f32 %v743_v18, %v125_v28 }
 0x11f   :  { %209 = vmatmul.f32.gmra.mxu0 %v144_v29  ;;  %235 = vmatmul.f32.gmra.mxu1 %v144_v29 }
 0x120   :  { %v130_v31 = vsel %vm129_vm9, %v743_v18, %v126_v30  ;;  %v527_v18 = vld [vmem:[#allocation6 + $0xa8] sm:$0xff]  ;;  %v509_v30 = vld [vmem:[#allocation6 + $0x18] sm:$0xff] }
 0x121   :  { %v133_v32 = vmul.f32 %v130_v31, %v895_v24  ;;  %v916_v24 = vperm.slane %v184_v21, 1  ;;  %v525_v31 = vld [vmem:[#allocation6 + $0x98] sm:$0xff]  ;;  %v508_v21 = vld [vmem:[#allocation6 + $0x10] sm:$0xff]  ;;  %550 = vmatpush.msra.mxu2 %v509_v30 }
 0x123   :  { %v139_v33 = vmul.f32 %v731_v8, %v133_v32  ;;  %v528_v8 = vld [vmem:[#allocation6 + $0xb0] sm:$0xff]  ;;  %551 = vmatpush.msra.mxu2 %v508_v21 }
 0x124   :  { %573 = vmatpush.msra.mxu3 %v528_v8 }
 0x125   :  { %v145_v34 = vadd.f32 %v732_v12, %v139_v33 }
 0x126   :  { %574 = vmatpush.msra.mxu3 %v527_v18 }
 0x127   :  { %212 = vmatmul.f32.gmra.mxu0 %v145_v34  ;;  %238 = vmatmul.f32.gmra.mxu1 %v145_v34 }
 0x128   :  { %575 = vmatpush.msra.mxu3 %v526_v27 }
 0x12a   :  { %576 = vmatpush.msra.mxu3 %v525_v31 }
 0x12c   :  { %577 = vmatpush.msra.mxu3 %v524_v43 }
 0x12e   :  { %578 = vmatpush.msra.mxu3 %v523_v51 }
 0x130   :  { %579 = vmatpush.msra.mxu3 %v522_v58 }
 0x194   :  { %v207_v44 = vpop.f32.mrf.mxu0  ;;  %v233_v45 = vpop.f32.mrf.mxu1 }
 0x195   :  { %v919_v48 = vadd.f32 %v207_v44, %v914_v41  ;;  %v922_v49 = vadd.f32 %v233_v45, %v916_v24  ;;  %v507_v45 = vld [vmem:[#allocation6 + $0x8] sm:$0xff] }
 0x196   :  { %552 = vmatpush.msra.mxu2 %v507_v45 }
 0x197   :  { %v925_v52 = vmul.f32 0.70710677, %v919_v48  ;;  %v928_v53 = vmul.f32 0.70710677, %v922_v49 }
 0x198   :  { %553 = vmatpush.msra.mxu2 %v506_v54 }
 0x199   :  { %v254_v56 = vmul.f32 %v925_v52, %v925_v52  ;;  %v294_v57 = vmul.f32 %v928_v53, %v928_v53 }
 0x19b   :  { %v934_v60 = vmin.f32 %v254_v56, 16.0  ;;  %v936_v61 = vmin.f32 %v294_v57, 16.0 }
 0x19c   :  { %v210_v62 = vpop.f32.mrf.mxu0  ;;  %v236_v63 = vpop.f32.mrf.mxu1 }
 0x19d   :  { %v256_v3 = vmul.f32 2.1237322e-06, %v934_v60  ;;  %v296_v4 = vmul.f32 2.1237322e-06, %v936_v61  ;;  %v941_v5 = vadd.f32 %v210_v62, %v914_v41  ;;  %v944_v6 = vadd.f32 %v236_v63, %v916_v24 }
 0x19e   :  { %v267_v9 = vmul.f32 3.8918573e-05, %v934_v60  ;;  %v307_v10 = vmul.f32 3.8918573e-05, %v936_v61 }
 0x19f   :  { %v257_v11 = vadd.f32 0.00028619796, %v256_v3  ;;  %v297_v12 = vadd.f32 0.00028619796, %v296_v4  ;;  %v949_v14 = vmul.f32 0.70710677, %v941_v5 }
 0x1a0   :  { %v952_v15 = vmul.f32 0.70710677, %v944_v6  ;;  %v268_v22 = vadd.f32 0.001143296, %v267_v9  ;;  %v308_v23 = vadd.f32 0.001143296, %v307_v10 }
 0x1a1   :  { %v258_v19 = vmul.f32 %v257_v11, %v934_v60  ;;  %v298_v20 = vmul.f32 %v297_v12, %v936_v61  ;;  %v334_v25 = vmul.f32 %v949_v14, %v949_v14 }
 0x1a2   :  { %v374_v16 = vmul.f32 %v952_v15, %v952_v15  ;;  %v269_v32 = vmul.f32 %v268_v22, %v934_v60  ;;  %v309_v37 = vmul.f32 %v308_v23, %v936_v61 }
 0x1a3   :  { %v259_v28 = vadd.f32 0.0036580483, %v258_v19  ;;  %v299_v29 = vadd.f32 0.0036580483, %v298_v20  ;;  %v961_v33 = vmin.f32 %v334_v25, 16.0 }
 0x1a4   :  { %v963_v34 = vmin.f32 %v374_v16, 16.0  ;;  %v213_v35 = vpop.f32.mrf.mxu0  ;;  %v239_v36 = vpop.f32.mrf.mxu1  ;;  %v270_v46 = vadd.f32 0.014752088, %v269_v32  ;;  %v310_v59 = vadd.f32 0.014752088, %v309_v37 }
 0x1a5   :  { %v260_v38 = vmul.f32 %v259_v28, %v934_v60  ;;  %v300_v39 = vmul.f32 %v299_v29, %v936_v61  ;;  %v969_v40 = vadd.f32 %v213_v35, %v914_v41  ;;  %v972_v42 = vadd.f32 %v239_v36, %v916_v24 }
 0x1a6   :  { %v336_v44 = vmul.f32 2.1237322e-06, %v961_v33  ;;  %v376_v50 = vmul.f32 2.1237322e-06, %v963_v34  ;;  %v271_v24 = vmul.f32 %v270_v46, %v934_v60  ;;  %v311_v4 = vmul.f32 %v310_v59, %v936_v61 }
 0x1a7   :  { %v261_v47 = vadd.f32 0.05243302, %v260_v38  ;;  %v301_v55 = vadd.f32 0.05243302, %v300_v39  ;;  %v977_v41 = vmul.f32 0.70710677, %v969_v40 }
 0x1a8   :  { %v337_v56 = vadd.f32 0.00028619796, %v336_v44  ;;  %v981_v57 = vmul.f32 0.70710677, %v972_v42  ;;  %v272_v63 = vadd.f32 0.112945676, %v271_v24 }
 0x1a9   :  { %v414_v62 = vmul.f32 %v977_v41, %v977_v41  ;;  %v262_v0 = vmul.f32 %v261_v47, %v934_v60  ;;  %v377_v1 = vadd.f32 0.00028619796, %v376_v50  ;;  %v302_v7 = vmul.f32 %v301_v55, %v936_v61 }
 0x1aa   :  { %v454_v3 = vmul.f32 %v981_v57, %v981_v57  ;;  %v338_v8 = vmul.f32 %v337_v56, %v961_v33  ;;  %v273_v10 = vmul.f32 %v272_v63, %v934_v60  ;;  %v312_v12 = vadd.f32 0.112945676, %v311_v4 }
 0x1ab   :  { %v991_v9 = vmin.f32 %v414_v62, 16.0  ;;  %v263_v19 = vadd.f32 0.18741608, %v262_v0  ;;  %v378_v20 = vmul.f32 %v377_v1, %v963_v34  ;;  %v303_v25 = vadd.f32 0.18741608, %v302_v7 }
 0x1ac   :  { %v994_v11 = vmin.f32 %v454_v3, 16.0  ;;  %v274_v18 = vadd.f32 0.4994258, %v273_v10  ;;  %v313_v23 = vmul.f32 %v312_v12, %v936_v61  ;;  %v339_v16 = vadd.f32 0.0036580483, %v338_v8 }
 0x1ad   :  { %v416_v17 = vmul.f32 2.1237322e-06, %v991_v9  ;;  %v264_v31 = vmul.f32 %v263_v19, %v934_v60  ;;  %v379_v32 = vadd.f32 0.0036580483, %v378_v20  ;;  %v347_v36 = vmul.f32 3.8918573e-05, %v961_v33 }
 0x1ae   :  { %v456_v22 = vmul.f32 2.1237322e-06, %v994_v11  ;;  %v275_v27 = vmul.f32 %v274_v18, %v934_v60  ;;  %v314_v29 = vadd.f32 0.4994258, %v313_v23  ;;  %v304_v21 = vmul.f32 %v303_v25, %v936_v61 }
 0x1af   :  { %v417_v26 = vadd.f32 0.00028619796, %v416_v17  ;;  %v340_v37 = vmul.f32 %v339_v16, %v961_v33  ;;  %v265_v44 = vadd.f32 1.1283791, %v264_v31  ;;  %v380_v45 = vmul.f32 %v379_v32, %v963_v34 }
 0x1b0   :  { %v457_v28 = vadd.f32 0.00028619796, %v456_v22  ;;  %v276_v30 = vadd.f32 1.0, %v275_v27  ;;  %v315_v35 = vmul.f32 %v314_v29, %v936_v61  ;;  %v348_v60 = vadd.f32 0.001143296, %v347_v36 }
 0x1b1   :  { %v418_v38 = vmul.f32 %v417_v26, %v991_v9  ;;  %v305_v46 = vadd.f32 1.1283791, %v304_v21  ;;  %v341_v47 = vadd.f32 0.05243302, %v340_v37  ;;  %v387_v61 = vmul.f32 3.8918573e-05, %v963_v34 }
 0x1b2   :  { %744 = vrcp.f32 %v276_v30  ;;  %v458_v39 = vmul.f32 %v457_v28, %v994_v11  ;;  %v1008_v43 = vadd.f32 1.0, %v315_v35  ;;  %v286_v55 = vand.u32 2147483647, %v276_v30 }
 0x1b3   :  { %v419_v50 = vadd.f32 0.0036580483, %v418_v38  ;;  %v349_v56 = vmul.f32 %v348_v60, %v961_v33  ;;  %v266_v24 = vmul.f32 %v265_v44, %v925_v52  ;;  %v381_v58 = vadd.f32 0.05243302, %v380_v45 }
 0x1b4   :  { %746 = vrcp.f32 %v1008_v43  ;;  %v459_v51 = vadd.f32 0.0036580483, %v458_v39  ;;  %v288_v62 = vand.u32 2147483648, %v276_v30  ;;  %v306_v63 = vmul.f32 %v305_v46, %v928_v53 }
 0x1b5   :  { %v1017_v0 = vmul.f32 %v341_v47, %v961_v33  ;;  %v420_v1 = vmul.f32 %v419_v50, %v991_v9  ;;  %v350_v3 = vadd.f32 0.014752088, %v349_v56  ;;  %vm282_vm10 = vweird.f32 %v276_v30 }
 0x1b6   :  { %v460_v4 = vmul.f32 %v459_v51, %v994_v11  ;;  %v388_v8 = vadd.f32 0.001143296, %v387_v61  ;;  %vm1021_vm11 = vcmp.eq.f32.partialorder %v286_v55, 8.507059e+37  ;;  %v427_v53 = vmul.f32 3.8918573e-05, %v991_v9 }
 0x1b7   :  { %v351_v52 = vmul.f32 %v350_v3, %v961_v33  ;;  %v467_v17 = vmul.f32 3.8918573e-05, %v994_v11  ;;  %v289_v19 = vor.u32 1.1754944e-38, %v288_v62  ;;  %v421_v22 = vadd.f32 0.05243302, %v420_v1 }
 0x1b8   :  { %v745_v54 = vpop.eup %744  ;;  %v389_v25 = vmul.f32 %v388_v8, %v963_v34  ;;  %v428_v16 = vadd.f32 0.001143296, %v427_v53  ;;  %v326_v28 = vand.u32 2147483647, %v1008_v43  ;;  %v328_v31 = vand.u32 2147483648, %v1008_v43 }
 0x1b9   :  { %v278_v59 = vmul.f32 %v745_v54, %v276_v30  ;;  %vm283_vm12 = vweird.f32 %v745_v54  ;;  %v352_v23 = vadd.f32 0.112945676, %v351_v52  ;;  %v468_v29 = vadd.f32 0.001143296, %v467_v17 }
 0x1ba   :  { %v747_v10 = vpop.eup %746  ;;  %vm284_vm13 = vmor %vm282_vm10, %vm283_vm12  ;;  %v390_v35 = vadd.f32 0.014752088, %v389_v25  ;;  %v429_v36 = vmul.f32 %v428_v16, %v991_v9  ;;  %vm322_vm15 = vweird.f32 %v1008_v43  ;;  %v329_v50 = vor.u32 1.1754944e-38, %v328_v31 }
 0x1bb   :  { %v279_v7 = vsub.f32 1.0, %v278_v59  ;;  %v318_v20 = vmul.f32 %v747_v10, %v1008_v43  ;;  %v353_v32 = vmul.f32 %v352_v23, %v961_v33  ;;  %vm323_vm14 = vweird.f32 %v747_v10 }
 0x1bc   :  { %v469_v38 = vmul.f32 %v468_v29, %v994_v11  ;;  %v391_v45 = vmul.f32 %v390_v35, %v963_v34  ;;  %v430_v30 = vadd.f32 0.014752088, %v429_v36  ;;  %vm324_vm0 = vmor %vm322_vm15, %vm323_vm14  ;;  %vm327_vm1 = vcmp.eq.f32.partialorder %v326_v28, 8.507059e+37 }
 0x1bd   :  { %v280_v18 = vmul.f32 %v745_v54, %v279_v7  ;;  %v319_v27 = vsub.f32 1.0, %v318_v20  ;;  %v354_v44 = vadd.f32 0.4994258, %v353_v32  ;;  %v242_v43 = vmul.f32 0.5, %v919_v48 }
 0x1be   :  { %v470_v47 = vadd.f32 0.014752088, %v469_v38  ;;  %v392_v61 = vadd.f32 0.112945676, %v391_v45  ;;  %v382_v52 = vmul.f32 %v381_v58, %v963_v34  ;;  %v422_v53 = vmul.f32 %v421_v22, %v991_v9 }
 0x1bf   :  { %v281_v26 = vadd.f32 %v745_v54, %v280_v18  ;;  %v320_v37 = vmul.f32 %v747_v10, %v319_v27  ;;  %v355_v51 = vmul.f32 %v354_v44, %v961_v33  ;;  %v461_v17 = vadd.f32 0.05243302, %v460_v4 }
 0x1c0   :  { %v471_v59 = vmul.f32 %v470_v47, %v994_v11  ;;  %v343_v23 = vadd.f32 0.18741608, %v1017_v0  ;;  %v243_v48 = vmul.f32 0.5, %v922_v49  ;;  %v423_v27 = vadd.f32 0.18741608, %v422_v53 }
 0x1c1   :  { %v285_v21 = vsel %vm284_vm13, %v745_v54, %v281_v26  ;;  %v321_v46 = vadd.f32 %v747_v10, %v320_v37  ;;  %v431_v54 = vmul.f32 %v430_v30, %v991_v9  ;;  %v356_v1 = vadd.f32 1.0, %v355_v51 }
 0x1c2   :  { %v290_v39 = vsel %vm1021_vm11, %v289_v19, %v285_v21  ;;  %v472_v12 = vadd.f32 0.112945676, %v471_v59  ;;  %v383_v26 = vadd.f32 0.18741608, %v382_v52  ;;  %v462_v4 = vmul.f32 %v461_v17, %v994_v11 }
 0x1c3   :  { %v291_v60 = vmul.f32 %v290_v39, %v266_v24  ;;  %v325_v56 = vsel %vm324_vm0, %v747_v10, %v321_v46  ;;  %v393_v24 = vmul.f32 %v392_v61, %v963_v34  ;;  %v432_v3 = vadd.f32 0.112945676, %v431_v54 }
 0x1c4   :  { %v330_v62 = vsel %vm327_vm1, %v329_v50, %v325_v56  ;;  %748 = vrcp.f32 %v356_v1  ;;  %v473_v25 = vmul.f32 %v472_v12, %v994_v11  ;;  %v344_v0 = vmul.f32 %v343_v23, %v961_v33 }
 0x1c5   :  { %v718_v55 = vclamps-f32 %v291_v60, 1.0  ;;  %v331_v8 = vmul.f32 %v330_v62, %v306_v63  ;;  %v394_v19 = vadd.f32 0.4994258, %v393_v24  ;;  %v433_v20 = vmul.f32 %v432_v3, %v991_v9 }
 0x1c6   :  { %v474_v22 = vadd.f32 0.4994258, %v473_v25  ;;  %v384_v36 = vmul.f32 %v383_v26, %v963_v34  ;;  %v424_v38 = vmul.f32 %v423_v27, %v991_v9  ;;  %v463_v39 = vadd.f32 0.18741608, %v462_v4 }
 0x1c7   :  { %v494_v7 = vadd.f32 1.0, %v718_v55  ;;  %v719_v18 = vclamps-f32 %v331_v8, 1.0  ;;  %v395_v16 = vmul.f32 %v394_v19, %v963_v34  ;;  %v434_v58 = vadd.f32 0.4994258, %v433_v20 }
 0x1c8   :  { %v475_v35 = vmul.f32 %v474_v22, %v994_v11  ;;  %v345_v45 = vadd.f32 1.1283791, %v344_v0  ;;  %v368_v30 = vand.u32 2147483648, %v356_v1  ;;  %v366_v60 = vand.u32 2147483647, %v356_v1 }
 0x1c9   :  { %v500_v10 = vmul.f32 %v494_v7, %v242_v43  ;;  %v495_v63 = vadd.f32 1.0, %v719_v18  ;;  %v396_v29 = vadd.f32 1.0, %v395_v16  ;;  %v435_v31 = vmul.f32 %v434_v58, %v991_v9 }
 0x1ca   :  { %v749_v32 = vpop.eup %748  ;;  %v1059_v37 = vadd.f32 1.0, %v475_v35  ;;  %v385_v46 = vadd.f32 1.1283791, %v384_v36  ;;  %v425_v34 = vadd.f32 1.1283791, %v424_v38  ;;  %v464_v50 = vmul.f32 %v463_v39, %v994_v11 }
 0x1cb   :  { %554 = vmatmul.f32.vlgmr.msra.gmra.mxu2 %v500_v10  ;;  %v501_v28 = vmul.f32 %v495_v63, %v243_v48  ;;  %v358_v49 = vmul.f32 %v749_v32, %v356_v1  ;;  %750 = vrcp.f32 %v396_v29  ;;  %v1057_v21 = vadd.f32 1.0, %v435_v31 }
 0x1cc   :  { %vm363_vm2 = vweird.f32 %v749_v32  ;;  %vm362_vm3 = vweird.f32 %v356_v1  ;;  %v346_v9 = vmul.f32 %v345_v45, %v949_v14  ;;  %v369_v61 = vor.u32 1.1754944e-38, %v368_v30 }
 0x1cd   :  { %580 = vmatmul.f32.vlgmr.msra.gmra.mxu3 %v501_v28  ;;  %v359_v44 = vsub.f32 1.0, %v358_v49  ;;  %752 = vrcp.f32 %v1057_v21  ;;  %vm364_vm4 = vmor %vm362_vm3, %vm363_vm2  ;;  %vm367_vm5 = vcmp.eq.f32.partialorder %v366_v60, 8.507059e+37  ;;  %v406_v56 = vand.u32 2147483647, %v396_v29 }
 0x1ce   :  { %754 = vrcp.f32 %v1059_v37  ;;  %v408_v59 = vand.u32 2147483648, %v396_v29  ;;  %v244_v24 = vmul.f32 0.5, %v941_v5  ;;  %v386_v3 = vmul.f32 %v385_v46, %v952_v15 }
 0x1cf   :  { %v360_v33 = vmul.f32 %v749_v32, %v359_v44  ;;  %v426_v11 = vmul.f32 %v425_v34, %v977_v41  ;;  %v465_v1 = vadd.f32 1.1283791, %v464_v50  ;;  %vm402_vm6 = vweird.f32 %v396_v29 }
 0x1d0   :  { %vm1071_vm8 = vcmp.eq.f32.partialorder %v406_v56, 8.507059e+37  ;;  %v409_v5 = vor.u32 1.1754944e-38, %v408_v59  ;;  %v446_v19 = vand.u32 2147483647, %v1057_v21  ;;  %v448_v41 = vand.u32 2147483648, %v1057_v21 }
 0x1d1   :  { %v751_v47 = vpop.eup %750  ;;  %v361_v51 = vadd.f32 %v749_v32, %v360_v33  ;;  %v488_v48 = vand.u32 2147483648, %v1059_v37  ;;  %v486_v58 = vand.u32 2147483647, %v1059_v37  ;;  %vm442_vm12 = vweird.f32 %v1057_v21 }
 0x1d2   :  { %v398_v54 = vmul.f32 %v751_v47, %v396_v29  ;;  %vm403_vm7 = vweird.f32 %v751_v47  ;;  %v449_v28 = vor.u32 1.1754944e-38, %v448_v41  ;;  %vm482_vm14 = vweird.f32 %v1059_v37 }
 0x1d3   :  { %v365_v55 = vsel %vm364_vm4, %v749_v32, %v361_v51  ;;  %v753_v62 = vpop.eup %752  ;;  %vm404_vm9 = vmor %vm402_vm6, %vm403_vm7  ;;  %v466_v31 = vmul.f32 %v465_v1, %v981_v57  ;;  %vm447_vm15 = vcmp.eq.f32.partialorder %v446_v19, 8.507059e+37  ;;  %v489_v0 = vor.u32 1.1754944e-38, %v488_v48 }
 0x1d4   :  { %v370_v43 = vsel %vm367_vm5, %v369_v61, %v365_v55  ;;  %v399_v7 = vsub.f32 1.0, %v398_v54  ;;  %v755_v8 = vpop.eup %754  ;;  %v438_v14 = vmul.f32 %v753_v62, %v1057_v21  ;;  %vm443_vm10 = vweird.f32 %v753_v62 }
 0x1d5   :  { %v371_v12 = vmul.f32 %v370_v43, %v346_v9  ;;  %v478_v53 = vmul.f32 %v755_v8, %v1059_v37  ;;  %vm483_vm11 = vweird.f32 %v755_v8  ;;  %vm444_vm13 = vmor %vm442_vm12, %vm443_vm10  ;;  %vm487_vm1 = vcmp.eq.f32.partialorder %v486_v58, 8.507059e+37 }
 0x1d6   :  { %v400_v52 = vmul.f32 %v751_v47, %v399_v7  ;;  %v439_v15 = vsub.f32 1.0, %v438_v14  ;;  %vm484_vm0 = vmor %vm482_vm14, %vm483_vm11  ;;  %v245_v39 = vmul.f32 0.5, %v944_v6  ;;  %v246_v57 = vmul.f32 0.5, %v969_v40  ;;  %v733_v6 = vld [vmem:[%s1123_s4] ss:$0 sm:$0xff] }
 0x1d7   :  { %v720_v17 = vclamps-f32 %v371_v12, 1.0  ;;  %v479_v20 = vsub.f32 1.0, %v478_v53  ;;  %v247_v34 = vmul.f32 0.5, %v972_v42  ;;  %v762_v40 = vld [vmem:[%s1119_s0] sm:$0xff] }
 0x1d8   :  { %v401_v18 = vadd.f32 %v751_v47, %v400_v52  ;;  %v440_v25 = vmul.f32 %v753_v62, %v439_v15 }
 0x1d9   :  { %v496_v23 = vadd.f32 1.0, %v720_v17  ;;  %v480_v16 = vmul.f32 %v755_v8, %v479_v20 }
 0x1da   :  { %v405_v63 = vsel %vm404_vm9, %v751_v47, %v401_v18  ;;  %v441_v22 = vadd.f32 %v753_v62, %v440_v25 }
 0x1db   :  { %v502_v26 = vmul.f32 %v496_v23, %v244_v24  ;;  %v410_v4 = vsel %vm1071_vm8, %v409_v5, %v405_v63  ;;  %v481_v29 = vadd.f32 %v755_v8, %v480_v16 }
 0x1dc   :  { %v411_v27 = vmul.f32 %v410_v4, %v386_v3  ;;  %v445_v32 = vsel %vm444_vm13, %v753_v62, %v441_v22  ;;  %v734_v22 = vld [vmem:[%s1124_s5] ss:$0 sm:$0xff] }
 0x1dd   :  { %557 = vmatmul.f32.gmra.mxu2 %v502_v26  ;;  %v450_v49 = vsel %vm447_vm15, %v449_v28, %v445_v32  ;;  %v485_v36 = vsel %vm484_vm0, %v755_v8, %v481_v29  ;;  %v735_v28 = vld [vmem:[%s1125_s6] ss:$0 sm:$0xff] }
 0x1de   :  { %v721_v35 = vclamps-f32 %v411_v27, 1.0  ;;  %v451_v38 = vmul.f32 %v450_v49, %v426_v11  ;;  %v490_v21 = vsel %vm487_vm1, %v489_v0, %v485_v36  ;;  %v763_v11 = vld [vmem:[%s1119_s0 + $0x10] sm:$0xff] }
 0x1df   :  { %v491_v45 = vmul.f32 %v490_v21, %v466_v31 }
 0x1e0   :  { %v497_v44 = vadd.f32 1.0, %v721_v35  ;;  %v722_v30 = vclamps-f32 %v451_v38, 1.0 }
 0x1e1   :  { %v723_v33 = vclamps-f32 %v491_v45, 1.0 }
 0x1e2   :  { %v503_v37 = vmul.f32 %v497_v44, %v245_v39  ;;  %v498_v60 = vadd.f32 1.0, %v722_v30 }
 0x1e3   :  { %v499_v46 = vadd.f32 1.0, %v723_v33 }
 0x1e4   :  { %583 = vmatmul.f32.gmra.mxu3 %v503_v37  ;;  %v504_v47 = vmul.f32 %v498_v60, %v246_v57 }
 0x1e5   :  { %v505_v50 = vmul.f32 %v499_v46, %v247_v34 }
 0x1e6   :  { %560 = vmatmul.f32.gmra.mxu2 %v504_v47 }
 0x1ec   :  { %586 = vmatmul.f32.gmra.mxu3 %v505_v50 }
 0x24e   :  { %v555_v51 = vpop.f32.mrf.mxu2 }
 0x250   :  { %v581_v9 = vpop.f32.mrf.mxu3 }
 0x251   :  { %v582_v61 = vadd.f32 %v581_v9, %v555_v51 }
 0x253   :  { %v624_v54 = vadd.f32 %v733_v6, %v582_v61 }
 0x255   :  { %v627_v55 = vadd.f32 %v762_v40, %v624_v54 }
 0x257   :  { %630 = vadd.xlane.f32.xlu0 %v627_v55 }
 0x260   :  { %v558_v56 = vpop.f32.mrf.mxu2 }
 0x267   :  { %v584_v59 = vpop.f32.mrf.mxu3 }
 0x268   :  { %v585_v42 = vadd.f32 %v584_v59, %v558_v56 }
 0x269   :  { %v561_v3 = vpop.f32.mrf.mxu2 }
 0x26a   :  { %v625_v62 = vadd.f32 %v733_v6, %v585_v42 }
 0x26c   :  { %v628_v24 = vadd.f32 %v625_v62, %v878_v2 }
 0x26e   :  { %632 = vadd.xlane.f32.xlu1 %v628_v24 }
 0x26f   :  { %v587_v43 = vpop.f32.mrf.mxu3 }
 0x270   :  { %v588_v7 = vadd.f32 %v587_v43, %v561_v3 }
 0x272   :  { %v626_v8 = vadd.f32 %v733_v6, %v588_v7 }
 0x274   :  { %v629_v1 = vadd.f32 %v763_v11, %v626_v8 }
 0x276   :  { %634 = vadd.xlane.f32.xlu2 %v629_v1 }
 0x2ca   :  { %v631_v12 = vpop.xlane.xlu0 %630 }
 0x2cb   :  { %v643_v14 = vmul.f32 %v631_v12, %v881_v13 }
 0x2cd   :  { %v646_v52 = vsub.f32 %v627_v55, %v643_v14 }
 0x2cf   :  { %v649_v53 = vmul.f32 %v646_v52, %v646_v52 }
 0x2d1   :  { %652 = vadd.xlane.f32.xlu0 %v649_v53 }
 0x2e1   :  { %v633_v17 = vpop.xlane.xlu1 %632 }
 0x2e2   :  { %v644_v2 = vmul.f32 %v633_v17, %v881_v13 }
 0x2e4   :  { %v647_v10 = vsub.f32 %v628_v24, %v644_v2 }
 0x2e6   :  { %v650_v5 = vmul.f32 %v647_v10, %v647_v10 }
 0x2e8   :  { %654 = vadd.xlane.f32.xlu1 %v650_v5 }
 0x2e9   :  { %v635_v15 = vpop.xlane.xlu2 %634 }
 0x2ea   :  { %v645_v18 = vmul.f32 %v635_v15, %v881_v13 }
 0x2ec   :  { %v648_v19 = vsub.f32 %v629_v1, %v645_v18 }
 0x2ee   :  { %v651_v41 = vmul.f32 %v648_v19, %v648_v19 }
 0x2f0   :  { %656 = vadd.xlane.f32.xlu2 %v651_v41 }
 0x344   :  { %v653_v20 = vpop.xlane.xlu0 %652 }
 0x345   :  { %v658_v23 = vmul.f32 %v653_v20, %v881_v13 }
 0x347   :  { %v661_v25 = vadd.f32 1e-06, %v658_v23 }
 0x349   :  { %756 = vrsqrt.f32 %v661_v25  ;;  %vm670_vm3 = vweird.f32 %v661_v25 }
 0x34f   :  { %v757_v48 = vpop.eup %756 }
 0x350   :  { %v665_v63 = vmul.f32 %v757_v48, %v661_v25  ;;  %vm671_vm2 = vweird.f32 %v757_v48 }
 0x351   :  { %vm672_vm4 = vmor %vm670_vm3, %vm671_vm2 }
 0x352   :  { %v666_v16 = vmul.f32 %v757_v48, %v665_v63 }
 0x354   :  { %v667_v58 = vmul.f32 0.5, %v666_v16 }
 0x356   :  { %v668_v26 = vsub.f32 1.5, %v667_v58 }
 0x358   :  { %v669_v4 = vmul.f32 %v757_v48, %v668_v26 }
 0x35a   :  { %v673_v27 = vsel %vm672_vm4, %v757_v48, %v669_v4 }
 0x35b   :  { %v694_v29 = vmul.f32 %v673_v27, %v646_v52  ;;  %v655_v32 = vpop.xlane.xlu1 %654 }
 0x35c   :  { %v659_v0 = vmul.f32 %v655_v32, %v881_v13 }
 0x35d   :  { %v700_v31 = vmul.f32 %v734_v22, %v694_v29 }
 0x35e   :  { %v662_v49 = vadd.f32 1e-06, %v659_v0 }
 0x35f   :  { %v706_v35 = vadd.f32 %v735_v28, %v700_v31 }
 0x360   :  { %758 = vrsqrt.f32 %v662_v49  ;;  %vm680_vm6 = vweird.f32 %v662_v49 }
 0x361   :  { %709 = vst [vmem:[%s1126_s7] sm:$0xff] %v706_v35 }
 0x363   :  { %v657_v36 = vpop.xlane.xlu2 %656 }
 0x364   :  { %v660_v38 = vmul.f32 %v657_v36, %v881_v13 }
 0x366   :  { %v759_v21 = vpop.eup %758  ;;  %v663_v39 = vadd.f32 1e-06, %v660_v38 }
 0x367   :  { %v675_v44 = vmul.f32 %v759_v21, %v662_v49  ;;  %vm681_vm5 = vweird.f32 %v759_v21 }
 0x368   :  { %760 = vrsqrt.f32 %v663_v39  ;;  %vm682_vm7 = vmor %vm680_vm6, %vm681_vm5  ;;  %vm690_vm9 = vweird.f32 %v663_v39 }
 0x369   :  { %v676_v45 = vmul.f32 %v759_v21, %v675_v44 }
 0x36b   :  { %v677_v30 = vmul.f32 0.5, %v676_v45 }
 0x36d   :  { %v678_v37 = vsub.f32 1.5, %v677_v30 }
 0x36e   :  { %v761_v33 = vpop.eup %760 }
 0x36f   :  { %v679_v57 = vmul.f32 %v759_v21, %v678_v37  ;;  %v685_v60 = vmul.f32 %v761_v33, %v663_v39  ;;  %vm691_vm8 = vweird.f32 %v761_v33 }
 0x370   :  { %vm692_vm10 = vmor %vm690_vm9, %vm691_vm8 }
 0x371   :  { %v683_v46 = vsel %vm682_vm7, %v759_v21, %v679_v57  ;;  %v686_v47 = vmul.f32 %v761_v33, %v685_v60 }
 0x372   :  { %v695_v34 = vmul.f32 %v683_v46, %v647_v10 }
 0x373   :  { %v687_v50 = vmul.f32 0.5, %v686_v47 }
 0x374   :  { %v701_v51 = vmul.f32 %v734_v22, %v695_v34 }
 0x375   :  { %v688_v6 = vsub.f32 1.5, %v687_v50 }
 0x376   :  { %v707_v13 = vadd.f32 %v735_v28, %v701_v51 }
 0x377   :  { %v689_v9 = vmul.f32 %v761_v33, %v688_v6 }
 0x378   :  { %710 = vst [vmem:[%s1126_s7 + $0x8] sm:$0xff] %v707_v13 }
 0x379   :  { %v693_v61 = vsel %vm692_vm10, %v761_v33, %v689_v9 }
 0x37a   :  { %v696_v54 = vmul.f32 %v693_v61, %v648_v19 }
 0x37c   :  { %v702_v40 = vmul.f32 %v734_v22, %v696_v54 }
 0x37e   :  { %v708_v55 = vadd.f32 %v735_v28, %v702_v40 }
 0x380   :  { %711 = vst [vmem:[%s1126_s7 + $0x10] sm:$0xff] %v708_v55 }
 0x381   :  { %716 = vsyncpa [#allocation5], 1 }
 0x382   :  { %717 = vsyncpa [#allocation7], 1 }

</bundles_post_ra>
